<compile_context>
chip_gen: v6e
topology: v6e:2x2x1
jax: 0.10.0
libtpu: 0.0.40
codegen_flags: <defaults>
</compile_context>

<pallas_src>
import functools

import jax
import jax.numpy as jnp
from jax.experimental import pallas as pl
from jax.experimental.pallas import tpu as pltpu

# bf16 MXU operands on all generations (v6e/v7x: ~2x MXU throughput; v5e: MXU takes bf16
# too and DMA bytes are halved). Accumulation is always f32.
COMPUTE_DTYPE = jnp.bfloat16
VMEM_LIMIT = 64 * 1024 * 1024


def _round_up(x, m):
    return (x + m - 1) // m * m


# --------------------------------------------------------------------------------------
# Pallas kernels
# --------------------------------------------------------------------------------------

def _matmul_kernel(a_ref, b_ref, o_ref, acc_ref):
    """Generic tiled matmul with K-accumulation in a VMEM scratch (f32 acc)."""
    @pl.when(pl.program_id(2) == 0)
    def _init():
        acc_ref[...] = jnp.zeros_like(acc_ref)

    acc_ref[...] += jnp.dot(a_ref[...], b_ref[...], preferred_element_type=jnp.float32)

    @pl.when(pl.program_id(2) == pl.num_programs(2) - 1)
    def _fin():
        o_ref[...] = acc_ref[...].astype(o_ref.dtype)


def _fused_mlp_kernel(x_ref, w1_ref, b1_ref, w2_ref, b2_ref, o_ref):
    """out_j = relu(x @ W1_j + b1_j) @ W2_j + b2_j for one head j and one row tile.

    Biaffine bias '1' column and zero padding to 128-aligned widths are folded into
    W2_j/b2_j, so the output slab is lane-dense. Elementwise math stays f32.
    """
    h = jnp.dot(x_ref[...], w1_ref[0], preferred_element_type=jnp.float32)
    h = jnp.maximum(h + b1_ref[0], 0.0)        # nn.ReLU; nn.Dropout is identity at inference
    o_ref[...] = (jnp.dot(h.astype(w2_ref.dtype), w2_ref[0],
                          preferred_element_type=jnp.float32) + b2_ref[0])


def _biaffine_kernel(h_ref, w_ref, dt_ref, o_ref):
    """score[b, o, x, y] = sum_ij h[b,x,i] * W[o,i,j] * d[b,y,j] for one (b, o).

    d is pre-transposed in the wrapper to (B, I1p, Sp), so both matmuls contract
    a leading/last pair with no in-kernel XLU transpose.
    """
    tmp = jnp.dot(h_ref[0], w_ref[0], preferred_element_type=jnp.float32)   # (S, I1p)
    o_ref[0, 0] = jnp.dot(tmp.astype(dt_ref.dtype), dt_ref[0],
                          preferred_element_type=jnp.float32)               # (S, Sp)


# --------------------------------------------------------------------------------------
# Pallas wrappers
# --------------------------------------------------------------------------------------

def matmul_pallas(a, b, *, tm_max=512, tn_max=512, tk_max=512):
    """f32-accumulating tiled matmul (M, K) @ (K, N) -> (M, N) on the MXU (bf16 operands)."""
    M, K = a.shape
    K2, N = b.shape
    assert K == K2

    a = a.astype(COMPUTE_DTYPE)      # cast BEFORE padding -> pad copy is half-size
    b = b.astype(COMPUTE_DTYPE)

    tm = min(tm_max, _round_up(M, 8))
    tk = min(tk_max, _round_up(K, 128))   # 128-aligned lane dims -> dense vregs / DMAs
    tn = min(tn_max, _round_up(N, 128))
    Mp, Kp, Np = _round_up(M, tm), _round_up(K, tk), _round_up(N, tn)

    if Mp != M or Kp != K:
        a = jnp.pad(a, ((0, Mp - M), (0, Kp - K)))
    if Kp != K or Np != N:
        b = jnp.pad(b, ((0, Kp - K), (0, Np - N)))

    out = pl.pallas_call(
        _matmul_kernel,
        out_shape=jax.ShapeDtypeStruct((Mp, Np), jnp.float32),
        grid_spec=pltpu.PrefetchScalarGridSpec(
            num_scalar_prefetch=0,
            grid=(Mp // tm, Np // tn, Kp // tk),
            in_specs=[
                pl.BlockSpec((tm, tk), lambda i, j, k: (i, k)),
                pl.BlockSpec((tk, tn), lambda i, j, k: (k, j)),
            ],
            out_specs=pl.BlockSpec((tm, tn), lambda i, j, k: (i, j)),
            scratch_shapes=[pltpu.VMEM((tm, tn), jnp.float32)],
        ),
        compiler_params=pltpu.CompilerParams(
            dimension_semantics=("parallel", "parallel", "arbitrary")),
    )(a, b)
    if Mp != M or Np != N:
        out = out[:M, :N]
    return out


def fused_mlp_forward(x, w1, b1, w2, b2, dinp, *, row_tile_max=512):
    """All 5 MLP heads via a head grid axis: [B, S, Din] -> [B, S, 5 * Omax] (lane-dense).

    w1: (5, Dinp, Hmax) bf16, b1: (5, 1, Hmax) f32, w2: (5, Hmax, Omax) bf16,
    b2: (5, 1, Omax) f32 (includes the folded biaffine bias '1' columns).
    """
    B, S, Din = x.shape
    n_heads, _, Hmax = w1.shape
    Omax = w2.shape[2]
    rows = B * S
    row_tile = min(row_tile_max, _round_up(rows, 8))
    Rp = _round_up(rows, row_tile)

    x2 = x.reshape(rows, Din).astype(COMPUTE_DTYPE)
    if Rp != rows or dinp != Din:
        x2 = jnp.pad(x2, ((0, Rp - rows), (0, dinp - Din)))

    out = pl.pallas_call(
        _fused_mlp_kernel,
        out_shape=jax.ShapeDtypeStruct((Rp, n_heads * Omax), jnp.float32),
        grid_spec=pltpu.PrefetchScalarGridSpec(
            num_scalar_prefetch=0,
            # Head axis outer: per-head weights are fetched once per head; the x row
            # tile's block index is constant over the head axis -> its DMA is reused.
            grid=(n_heads, Rp // row_tile),
            in_specs=[
                pl.BlockSpec((row_tile, dinp), lambda j, i: (i, 0)),
                pl.BlockSpec((1, dinp, Hmax), lambda j, i: (j, 0, 0)),
                pl.BlockSpec((1, 1, Hmax), lambda j, i: (j, 0, 0)),
                pl.BlockSpec((1, Hmax, Omax), lambda j, i: (j, 0, 0)),
                pl.BlockSpec((1, 1, Omax), lambda j, i: (j, 0, 0)),
            ],
            out_specs=pl.BlockSpec((row_tile, Omax), lambda j, i: (i, j)),
        ),
        compiler_params=pltpu.CompilerParams(
            dimension_semantics=("parallel", "parallel"),
            vmem_limit_bytes=VMEM_LIMIT),
    )(x2, w1, b1, w2, b2)
    return out[:rows].reshape(B, S, n_heads * Omax)


def biaffine_forward(h, d, w_blocks):
    """Fused biaffine scores [B, O, S, S] with no HBM intermediate.

    h, d: [B, S, I1p] (bias column + zero padding already included, I1p % 128 == 0)
    w_blocks: [O, I1p, I1p] bf16 (zero-padded xavier weight).
    """
    B, S, I1p = h.shape
    O = w_blocks.shape[0]
    Sp = _round_up(S, 128)                      # lane-dense score stores

    h_c = h.astype(COMPUTE_DTYPE)
    dt = jnp.transpose(d.astype(COMPUTE_DTYPE), (0, 2, 1))     # (B, I1p, S): no in-kernel transpose
    if Sp != S:
        dt = jnp.pad(dt, ((0, 0), (0, 0), (0, Sp - S)))

    out = pl.pallas_call(
        _biaffine_kernel,
        out_shape=jax.ShapeDtypeStruct((B, O, S, Sp), jnp.float32),
        grid_spec=pltpu.PrefetchScalarGridSpec(
            num_scalar_prefetch=0,
            # o outer -> the o-th W block's DMA is reused across the whole batch.
            grid=(O, B),
            in_specs=[
                pl.BlockSpec((1, S, I1p), lambda o, b: (b, 0, 0)),
                pl.BlockSpec((1, I1p, I1p), lambda o, b: (o, 0, 0)),
                pl.BlockSpec((1, I1p, Sp), lambda o, b: (b, 0, 0)),
            ],
            out_specs=pl.BlockSpec((1, 1, S, Sp), lambda o, b: (b, o, 0, 0)),
        ),
        compiler_params=pltpu.CompilerParams(
            dimension_semantics=("parallel", "parallel"),
            vmem_limit_bytes=VMEM_LIMIT),
    )(h_c, w_blocks, dt)
    if Sp != S:
        out = out[:, :, :, :S]
    return out


# --------------------------------------------------------------------------------------
# BiLSTM encoder: input projection hoisted into a Pallas matmul; recurrence in lax.scan.
# --------------------------------------------------------------------------------------

def _bilstm_layer(x, lengths, layer):
    """One bidirectional LSTM layer with pack_padded semantics (zero-padded outputs)."""
    B, T, Din = x.shape
    H = layer["w_hh"].shape[1]

    # Hoisted input projection for BOTH directions at once (one MXU matmul).
    proj = matmul_pallas(x.reshape(B * T, Din), layer["w_ih_cat"]) + layer["b_cat"]
    proj = proj.reshape(B, T, 8 * H)
    xf = jnp.transpose(proj[..., : 4 * H], (1, 0, 2))          # (T, B, 4H), time ascending
    xb = jnp.transpose(proj[..., 4 * H:], (1, 0, 2))[::-1]     # step s <-> time T-1-s

    t_idx = jnp.arange(T)
    valid_f = t_idx[:, None] < lengths[None, :]                 # (T, B)
    valid_b = (T - 1 - t_idx)[:, None] < lengths[None, :]       # (T, B)

    w_hh = layer["w_hh"]                                        # (2, H, 4H), f32

    def step(carry, inp):
        h, c = carry                                            # (2, B, H) each
        xt_f, xt_b, vf, vb = inp
        xt = jnp.stack([xt_f, xt_b], axis=0)                    # (2, B, 4H)
        gates = xt + jnp.einsum("dbh,dhg->dbg", h, w_hh)
        i, f, g, o = jnp.split(gates, 4, axis=-1)
        c_new = jax.nn.sigmoid(f) * c + jax.nn.sigmoid(i) * jnp.tanh(g)
        h_new = jax.nn.sigmoid(o) * jnp.tanh(c_new)
        valid = jnp.stack([vf, vb], axis=0)[..., None]          # (2, B, 1)
        h = jnp.where(valid, h_new, h)
        c = jnp.where(valid, c_new, c)
        out = jnp.where(valid, h_new, 0.0)                      # pad_packed zero-pads
        return (h, c), out

    h0 = jnp.zeros((2, B, H), jnp.float32)
    c0 = jnp.zeros((2, B, H), jnp.float32)
    _, outs = jax.lax.scan(step, (h0, c0), (xf, xb, valid_f, valid_b))   # (T, 2, B, H)

    out_f = jnp.transpose(outs[:, 0], (1, 0, 2))                # (B, T, H)
    out_b = jnp.transpose(outs[::-1, 1], (1, 0, 2))             # back to time-ascending
    return jnp.concatenate([out_f, out_b], axis=-1)             # (B, T, 2H)


# --------------------------------------------------------------------------------------
# Full BiAffineParser forward
# --------------------------------------------------------------------------------------

def biaffine_parser_forward(fp, lex_emb, char_embed, ft_embed, sent_lengths):
    # xinput = torch.cat((lex_emb, char_embed, ft_embed), dim=2)
    xinput = jnp.concatenate([lex_emb, char_embed, ft_embed], axis=2)

    # dep_rnn (3-layer BiLSTM, batch_first, bidirectional)
    dep = xinput
    for layer in fp["lstm"]:
        dep = _bilstm_layer(dep, sent_lengths, layer)

    # All 5 MLP heads in one fused Pallas call; slab layout (Omax-strided, 128-aligned):
    #   [tag | arc_h | arc_d | lab_h | lab_d], each head occupying Omax lanes.
    y = fused_mlp_forward(dep, fp["w1"], fp["b1"], fp["w2"], fp["b2"], fp["dinp"])
    n_tags, I1p, Omax = fp["n_tags"], fp["i1p"], fp["omax"]

    tag_scores = y[..., :n_tags]
    arc_h = y[..., Omax:Omax + I1p]
    arc_d = y[..., 2 * Omax:2 * Omax + I1p]
    lab_h = y[..., 3 * Omax:3 * Omax + I1p]
    lab_d = y[..., 4 * Omax:4 * Omax + I1p]

    arc_scores = biaffine_forward(arc_h, arc_d, fp["w_arc"])[:, 0]   # .squeeze(1)
    lab_scores = biaffine_forward(lab_h, lab_d, fp["w_lab"])
    return tag_scores, arc_scores, lab_scores


# --------------------------------------------------------------------------------------
# Deterministic parameter construction + fusion/padding prep
# --------------------------------------------------------------------------------------

def _uniform(key, shape, scale):
    return jax.random.uniform(key, shape, jnp.float32, minval=-scale, maxval=scale)


def make_params(key, *, input_size, mlp_input, mlp_tag_hidden, mlp_arc_hidden,
                mlp_lab_hidden, n_tags, n_labels):
    keys = iter(jax.random.split(key, 64))
    H = mlp_input

    def lstm_dir(in_dim):
        s = 1.0 / jnp.sqrt(H)
        return {
            "w_ih": _uniform(next(keys), (4 * H, in_dim), s),
            "w_hh": _uniform(next(keys), (4 * H, H), s),
            "b_ih": _uniform(next(keys), (4 * H,), s),
            "b_hh": _uniform(next(keys), (4 * H,), s),
        }

    lstm = []
    for layer_idx in range(3):
        in_dim = input_size if layer_idx == 0 else 2 * H
        lstm.append({"fw": lstm_dir(in_dim), "bw": lstm_dir(in_dim)})

    def mlp(in_dim, hid, out_dim):
        s1 = 1.0 / jnp.sqrt(in_dim)
        s2 = 1.0 / jnp.sqrt(hid)
        return (
            _uniform(next(keys), (in_dim, hid), s1),   # Wdown (stored x-out)
            _uniform(next(keys), (hid,), s1),
            _uniform(next(keys), (hid, out_dim), s2),  # Wup
            _uniform(next(keys), (out_dim,), s2),
        )

    def xavier(shape):
        bound = jnp.sqrt(6.0 / (shape[1] + shape[2]))
        return _uniform(next(keys), shape, bound)

    I1 = mlp_input + 1  # biased_biaffine=True -> bias column appended
    return {
        "lstm": lstm,
        "pos_tagger": mlp(2 * H, mlp_tag_hidden, n_tags),
        "arc_mlp_h": mlp(2 * H, mlp_arc_hidden, mlp_input),
        "arc_mlp_d": mlp(2 * H, mlp_arc_hidden, mlp_input),
        "lab_mlp_h": mlp(2 * H, mlp_lab_hidden, mlp_input),
        "lab_mlp_d": mlp(2 * H, mlp_lab_hidden, mlp_input),
        "arc_biaffine": xavier((1, I1, I1)),
        "lab_biaffine": xavier((n_labels, I1, I1)),
    }


def _prep_lstm_layer(layer):
    """Fuse fwd+bwd input projections and biases; stack hidden-hidden weights."""
    return {
        "w_ih_cat": jnp.concatenate([layer["fw"]["w_ih"].T, layer["bw"]["w_ih"].T],
                                    axis=1).astype(COMPUTE_DTYPE),   # cast once here
        "b_cat": jnp.concatenate([layer["fw"]["b_ih"] + layer["fw"]["b_hh"],
                                  layer["bw"]["b_ih"] + layer["bw"]["b_hh"]], axis=0),
        "w_hh": jnp.stack([layer["fw"]["w_hh"].T, layer["bw"]["w_hh"].T], axis=0),
    }


def build_fused_params(params, *, mlp_input, n_tags, n_labels):
    """Pad/stack the 5 MLP heads per-head (no block-diagonal zeros in the matmuls)
    and zero-pad the biaffine weights; cast all MXU weight operands to bf16 once."""
    I1 = mlp_input + 1
    I1p = _round_up(I1, 128)          # 128-aligned biaffine contraction width
    Tp = _round_up(n_tags, 128)
    Omax = max(Tp, I1p)               # common 128-aligned output width for all heads

    heads = [
        ("pos_tagger", n_tags, False),
        ("arc_mlp_h", mlp_input, True),
        ("arc_mlp_d", mlp_input, True),
        ("lab_mlp_h", mlp_input, True),
        ("lab_mlp_d", mlp_input, True),
    ]
    Din = params["pos_tagger"][0].shape[0]
    Dinp = _round_up(Din, 128)
    Hmax = _round_up(max(params[name][0].shape[1] for name, *_ in heads), 128)

    w1 = jnp.zeros((5, Dinp, Hmax), jnp.float32)
    b1 = jnp.zeros((5, 1, Hmax), jnp.float32)
    w2 = jnp.zeros((5, Hmax, Omax), jnp.float32)
    b2 = jnp.zeros((5, 1, Omax), jnp.float32)
    for j, (name, odim, add_bias_col) in enumerate(heads):
        wd, bd, wu, bu = params[name]
        hid = wd.shape[1]
        w1 = w1.at[j, :Din, :hid].set(wd)
        b1 = b1.at[j, 0, :hid].set(bd)
        w2 = w2.at[j, :hid, :odim].set(wu)
        b2 = b2.at[j, 0, :odim].set(bu)
        if add_bias_col:
            b2 = b2.at[j, 0, odim].set(1.0)      # biaffine bias '1' column folded in

    def prep_biaffine_w(w):                      # (O, I1, I1) -> (O, I1p, I1p) bf16
        O = w.shape[0]
        wp = jnp.zeros((O, I1p, I1p), jnp.float32).at[:, :I1, :I1].set(w)
        return wp.astype(COMPUTE_DTYPE)

    return {
        "lstm": [_prep_lstm_layer(l) for l in params["lstm"]],
        "w1": w1.astype(COMPUTE_DTYPE), "b1": b1,
        "w2": w2.astype(COMPUTE_DTYPE), "b2": b2,
        "w_arc": prep_biaffine_w(params["arc_biaffine"]),
        "w_lab": prep_biaffine_w(params["lab_biaffine"]),
        "n_tags": n_tags, "n_labels": n_labels,
        "i1p": I1p, "omax": Omax, "dinp": Dinp,
    }


# --------------------------------------------------------------------------------------
# Main
# --------------------------------------------------------------------------------------

if __name__ == "__main__":
    B, S = 2, 8
    lex_dim, char_dim, ft_dim = 16, 8, 8          # lexer / char_rnn / ft_lexer embedding sizes
    mlp_input = 32
    mlp_tag_hidden = 32
    mlp_arc_hidden = 32
    mlp_lab_hidden = 32
    n_tags = 8
    n_labels = 4

    key = jax.random.PRNGKey(0)
    k_par, k_lex, k_char, k_ft = jax.random.split(key, 4)

    params = make_params(
        k_par,
        input_size=lex_dim + char_dim + ft_dim,
        mlp_input=mlp_input,
        mlp_tag_hidden=mlp_tag_hidden,
        mlp_arc_hidden=mlp_arc_hidden,
        mlp_lab_hidden=mlp_lab_hidden,
        n_tags=n_tags,
        n_labels=n_labels,
    )
    fused = build_fused_params(params, mlp_input=mlp_input, n_tags=n_tags, n_labels=n_labels)

    lex_emb = jax.random.normal(k_lex, (B, S, lex_dim), jnp.float32)
    char_embed = jax.random.normal(k_char, (B, S, char_dim), jnp.float32)
    ft_embed = jax.random.normal(k_ft, (B, S, ft_dim), jnp.float32)
    sent_lengths = jnp.array([8, 6], dtype=jnp.int32)

    fwd = jax.jit(functools.partial(biaffine_parser_forward, fused))
    tag_scores, arc_scores, lab_scores = fwd(lex_emb, char_embed, ft_embed, sent_lengths)
    jax.block_until_ready((tag_scores, arc_scores, lab_scores))

    assert tag_scores.shape == (B, S, n_tags)
    assert arc_scores.shape == (B, S, S)
    assert lab_scores.shape == (B, n_labels, S, S)
    print("KERNEL_OK")
</pallas_src>

<mosaic_0001>
module attributes {stable_mosaic.version = 11 : i64} {
  func.func @_matmul_kernel(%arg0: i32, %arg1: i32, %arg2: i32, %arg3: memref<16x128xbf16, #tpu.memory_space<vmem>>, %arg4: memref<128x256xbf16, #tpu.memory_space<vmem>>, %arg5: memref<16x256xf32, #tpu.memory_space<vmem>>, %arg6: memref<16x256xf32, #tpu.memory_space<vmem>>) attributes {dimension_semantics = [#tpu.dimension_semantics<parallel>, #tpu.dimension_semantics<parallel>, #tpu.dimension_semantics<arbitrary>], iteration_bounds = array<i64: 1, 1, 1>, scalar_prefetch = 0 : i64, scratch_operands = 1 : i64, tpu.core_type = #tpu.core_type<tc>, window_params = [{transform_indices = @transform_0, window_bounds = array<i64: 16, 128>}, {transform_indices = @transform_1, window_bounds = array<i64: 128, 256>}, {transform_indices = @transform_2, window_bounds = array<i64: 16, 256>}]} {
    %c0_i32 = arith.constant 0 : i32
    %0 = arith.cmpi eq, %arg2, %c0_i32 : i32
    %1 = arith.extui %0 : i1 to i32
    %c0_i32_0 = arith.constant 0 : i32
    %2 = arith.cmpi ne, %1, %c0_i32_0 : i32
    scf.if %2 {
      %cst_10 = arith.constant 0.000000e+00 : f32
      %12 = vector.broadcast %cst_10 : f32 to vector<16x256xf32>
      %c0_11 = arith.constant 0 : index
      %c0_12 = arith.constant 0 : index
      %13 = vector.load %arg6[%c0_11, %c0_12] : memref<16x256xf32, #tpu.memory_space<vmem>>, vector<16x256xf32>
      tpu.vector_store %arg6[%c0_11, %c0_12], %12 {strides = array<i32>} : memref<16x256xf32, #tpu.memory_space<vmem>>, vector<16x256xf32>,
    } else {
    }
    %c0 = arith.constant 0 : index
    %c0_1 = arith.constant 0 : index
    %3 = vector.load %arg6[%c0, %c0_1] : memref<16x256xf32, #tpu.memory_space<vmem>>, vector<16x256xf32>
    %c0_2 = arith.constant 0 : index
    %c0_3 = arith.constant 0 : index
    %4 = vector.load %arg3[%c0_2, %c0_3] : memref<16x128xbf16, #tpu.memory_space<vmem>>, vector<16x128xbf16>
    %c0_4 = arith.constant 0 : index
    %c0_5 = arith.constant 0 : index
    %5 = vector.load %arg4[%c0_4, %c0_5] : memref<128x256xbf16, #tpu.memory_space<vmem>>, vector<128x256xbf16>
    %cst = arith.constant dense<0.000000e+00> : vector<16x256xf32>
    %6 = tpu.matmul %4, %5, %cst {dimension_numbers = #tpu.dot_dimension_numbers<[1], [0], [0], [1], [0, 0, 1, 1], [], []>} : vector<16x128xbf16>, vector<128x256xbf16>, vector<16x256xf32> -> vector<16x256xf32>
    %7 = arith.addf %3, %6 : vector<16x256xf32>
    %c0_6 = arith.constant 0 : index
    %c0_7 = arith.constant 0 : index
    %8 = vector.load %arg6[%c0_6, %c0_7] : memref<16x256xf32, #tpu.memory_space<vmem>>, vector<16x256xf32>
    tpu.vector_store %arg6[%c0_6, %c0_7], %7 {strides = array<i32>} : memref<16x256xf32, #tpu.memory_space<vmem>>, vector<16x256xf32>,
    %c0_i32_8 = arith.constant 0 : i32
    %9 = arith.cmpi eq, %arg2, %c0_i32_8 : i32
    %10 = arith.extui %9 : i1 to i32
    %c0_i32_9 = arith.constant 0 : i32
    %11 = arith.cmpi ne, %10, %c0_i32_9 : i32
    scf.if %11 {
      %c0_10 = arith.constant 0 : index
      %c0_11 = arith.constant 0 : index
      %12 = vector.load %arg6[%c0_10, %c0_11] : memref<16x256xf32, #tpu.memory_space<vmem>>, vector<16x256xf32>
      %c0_12 = arith.constant 0 : index
      %c0_13 = arith.constant 0 : index
      %13 = vector.load %arg5[%c0_12, %c0_13] : memref<16x256xf32, #tpu.memory_space<vmem>>, vector<16x256xf32>
      tpu.vector_store %arg5[%c0_12, %c0_13], %12 {strides = array<i32>} : memref<16x256xf32, #tpu.memory_space<vmem>>, vector<16x256xf32>,
    } else {
    }
    return
  }
  func.func @transform_0(%arg0: i32, %arg1: i32, %arg2: i32) -> (i32, i32) {
    %c0_i32 = arith.constant 0 : i32
    return %arg0, %arg2 : i32, i32
  }
  func.func @transform_1(%arg0: i32, %arg1: i32, %arg2: i32) -> (i32, i32) {
    %c0_i32 = arith.constant 0 : i32
    return %arg2, %arg1 : i32, i32
  }
  func.func @transform_2(%arg0: i32, %arg1: i32, %arg2: i32) -> (i32, i32) {
    %c0_i32 = arith.constant 0 : i32
    return %arg0, %arg1 : i32, i32
  }
}

module attributes {stable_mosaic.version = 11 : i64} {
  func.func @_fused_mlp_kernel(%arg0: i32, %arg1: i32, %arg2: memref<16x128xbf16, #tpu.memory_space<vmem>>, %arg3: memref<1x128x128xbf16, #tpu.memory_space<vmem>>, %arg4: memref<1x1x128xf32, #tpu.memory_space<vmem>>, %arg5: memref<1x128x128xbf16, #tpu.memory_space<vmem>>, %arg6: memref<1x1x128xf32, #tpu.memory_space<vmem>>, %arg7: memref<16x128xf32, #tpu.memory_space<vmem>>) attributes {dimension_semantics = [#tpu.dimension_semantics<parallel>, #tpu.dimension_semantics<parallel>], iteration_bounds = array<i64: 5, 1>, scalar_prefetch = 0 : i64, scratch_operands = 0 : i64, tpu.core_type = #tpu.core_type<tc>, window_params = [{transform_indices = @transform_0, window_bounds = array<i64: 16, 128>}, {transform_indices = @transform_1, window_bounds = array<i64: 1, 128, 128>}, {transform_indices = @transform_2, window_bounds = array<i64: 1, 1, 128>}, {transform_indices = @transform_3, window_bounds = array<i64: 1, 128, 128>}, {transform_indices = @transform_4, window_bounds = array<i64: 1, 1, 128>}, {transform_indices = @transform_5, window_bounds = array<i64: 16, 128>}]} {
    %c0 = arith.constant 0 : index
    %c0_0 = arith.constant 0 : index
    %0 = vector.load %arg2[%c0, %c0_0] : memref<16x128xbf16, #tpu.memory_space<vmem>>, vector<16x128xbf16>
    %c0_1 = arith.constant 0 : index
    %c0_2 = arith.constant 0 : index
    %c0_3 = arith.constant 0 : index
    %1 = vector.load %arg3[%c0_1, %c0_2, %c0_3] : memref<1x128x128xbf16, #tpu.memory_space<vmem>>, vector<1x128x128xbf16>
    %2 = vector.shape_cast %1 : vector<1x128x128xbf16> to vector<128x128xbf16>
    %cst = arith.constant dense<0.000000e+00> : vector<16x128xf32>
    %3 = tpu.matmul %0, %2, %cst {dimension_numbers = #tpu.dot_dimension_numbers<[1], [0], [0], [1], [0, 0, 1, 1], [], []>} : vector<16x128xbf16>, vector<128x128xbf16>, vector<16x128xf32> -> vector<16x128xf32>
    %c0_4 = arith.constant 0 : index
    %c0_5 = arith.constant 0 : index
    %c0_6 = arith.constant 0 : index
    %4 = vector.load %arg4[%c0_4, %c0_5, %c0_6] : memref<1x1x128xf32, #tpu.memory_space<vmem>>, vector<1x1x128xf32>
    %5 = vector.shape_cast %4 : vector<1x1x128xf32> to vector<1x128xf32>
    %6 = vector.broadcast %5 : vector<1x128xf32> to vector<16x128xf32>
    %7 = arith.addf %3, %6 : vector<16x128xf32>
    %cst_7 = arith.constant 0.000000e+00 : f32
    %8 = vector.broadcast %cst_7 : f32 to vector<16x128xf32>
    %9 = arith.maximumf %7, %8 : vector<16x128xf32>
    %10 = arith.truncf %9 : vector<16x128xf32> to vector<16x128xbf16>
    %c0_8 = arith.constant 0 : index
    %c0_9 = arith.constant 0 : index
    %c0_10 = arith.constant 0 : index
    %11 = vector.load %arg5[%c0_8, %c0_9, %c0_10] : memref<1x128x128xbf16, #tpu.memory_space<vmem>>, vector<1x128x128xbf16>
    %12 = vector.shape_cast %11 : vector<1x128x128xbf16> to vector<128x128xbf16>
    %cst_11 = arith.constant dense<0.000000e+00> : vector<16x128xf32>
    %13 = tpu.matmul %10, %12, %cst_11 {dimension_numbers = #tpu.dot_dimension_numbers<[1], [0], [0], [1], [0, 0, 1, 1], [], []>} : vector<16x128xbf16>, vector<128x128xbf16>, vector<16x128xf32> -> vector<16x128xf32>
    %c0_12 = arith.constant 0 : index
    %c0_13 = arith.constant 0 : index
    %c0_14 = arith.constant 0 : index
    %14 = vector.load %arg6[%c0_12, %c0_13, %c0_14] : memref<1x1x128xf32, #tpu.memory_space<vmem>>, vector<1x1x128xf32>
    %15 = vector.shape_cast %14 : vector<1x1x128xf32> to vector<1x128xf32>
    %16 = vector.broadcast %15 : vector<1x128xf32> to vector<16x128xf32>
    %17 = arith.addf %13, %16 : vector<16x128xf32>
    %c0_15 = arith.constant 0 : index
    %c0_16 = arith.constant 0 : index
    %18 = vector.load %arg7[%c0_15, %c0_16] : memref<16x128xf32, #tpu.memory_space<vmem>>, vector<16x128xf32>
    tpu.vector_store %arg7[%c0_15, %c0_16], %17 {strides = array<i32>} : memref<16x128xf32, #tpu.memory_space<vmem>>, vector<16x128xf32>,
    return
  }
  func.func @transform_0(%arg0: i32, %arg1: i32) -> (i32, i32) {
    %c0_i32 = arith.constant 0 : i32
    %c0_i32_0 = arith.constant 0 : i32
    return %arg1, %c0_i32 : i32, i32
  }
  func.func @transform_1(%arg0: i32, %arg1: i32) -> (i32, i32, i32) {
    %c0_i32 = arith.constant 0 : i32
    %c0_i32_0 = arith.constant 0 : i32
    %c0_i32_1 = arith.constant 0 : i32
    return %arg0, %c0_i32, %c0_i32_0 : i32, i32, i32
  }
  func.func @transform_2(%arg0: i32, %arg1: i32) -> (i32, i32, i32) {
    %c0_i32 = arith.constant 0 : i32
    %c0_i32_0 = arith.constant 0 : i32
    %c0_i32_1 = arith.constant 0 : i32
    return %arg0, %c0_i32, %c0_i32_0 : i32, i32, i32
  }
  func.func @transform_3(%arg0: i32, %arg1: i32) -> (i32, i32, i32) {
    %c0_i32 = arith.constant 0 : i32
    %c0_i32_0 = arith.constant 0 : i32
    %c0_i32_1 = arith.constant 0 : i32
    return %arg0, %c0_i32, %c0_i32_0 : i32, i32, i32
  }
  func.func @transform_4(%arg0: i32, %arg1: i32) -> (i32, i32, i32) {
    %c0_i32 = arith.constant 0 : i32
    %c0_i32_0 = arith.constant 0 : i32
    %c0_i32_1 = arith.constant 0 : i32
    return %arg0, %c0_i32, %c0_i32_0 : i32, i32, i32
  }
  func.func @transform_5(%arg0: i32, %arg1: i32) -> (i32, i32) {
    %c0_i32 = arith.constant 0 : i32
    return %arg1, %arg0 : i32, i32
  }
}

module attributes {stable_mosaic.version = 11 : i64} {
  func.func @_biaffine_kernel(%arg0: i32, %arg1: i32, %arg2: memref<1x8x128xbf16, #tpu.memory_space<vmem>>, %arg3: memref<1x128x128xbf16, #tpu.memory_space<vmem>>, %arg4: memref<1x128x128xbf16, #tpu.memory_space<vmem>>, %arg5: memref<1x1x8x128xf32, #tpu.memory_space<vmem>>) attributes {dimension_semantics = [#tpu.dimension_semantics<parallel>, #tpu.dimension_semantics<parallel>], iteration_bounds = array<i64: 1, 2>, scalar_prefetch = 0 : i64, scratch_operands = 0 : i64, tpu.core_type = #tpu.core_type<tc>, window_params = [{transform_indices = @transform_0, window_bounds = array<i64: 1, 8, 128>}, {transform_indices = @transform_1, window_bounds = array<i64: 1, 128, 128>}, {transform_indices = @transform_2, window_bounds = array<i64: 1, 128, 128>}, {transform_indices = @transform_3, window_bounds = array<i64: 1, 1, 8, 128>}]} {
    %c0 = arith.constant 0 : index
    %c0_0 = arith.constant 0 : index
    %c0_1 = arith.constant 0 : index
    %0 = vector.load %arg2[%c0, %c0_0, %c0_1] : memref<1x8x128xbf16, #tpu.memory_space<vmem>>, vector<1x8x128xbf16>
    %1 = vector.shape_cast %0 : vector<1x8x128xbf16> to vector<8x128xbf16>
    %c0_2 = arith.constant 0 : index
    %c0_3 = arith.constant 0 : index
    %c0_4 = arith.constant 0 : index
    %2 = vector.load %arg3[%c0_2, %c0_3, %c0_4] : memref<1x128x128xbf16, #tpu.memory_space<vmem>>, vector<1x128x128xbf16>
    %3 = vector.shape_cast %2 : vector<1x128x128xbf16> to vector<128x128xbf16>
    %cst = arith.constant dense<0.000000e+00> : vector<8x128xf32>
    %4 = tpu.matmul %1, %3, %cst {dimension_numbers = #tpu.dot_dimension_numbers<[1], [0], [0], [1], [0, 0, 1, 1], [], []>} : vector<8x128xbf16>, vector<128x128xbf16>, vector<8x128xf32> -> vector<8x128xf32>
    %5 = arith.truncf %4 : vector<8x128xf32> to vector<8x128xbf16>
    %c0_5 = arith.constant 0 : index
    %c0_6 = arith.constant 0 : index
    %c0_7 = arith.constant 0 : index
    %6 = vector.load %arg4[%c0_5, %c0_6, %c0_7] : memref<1x128x128xbf16, #tpu.memory_space<vmem>>, vector<1x128x128xbf16>
    %7 = vector.shape_cast %6 : vector<1x128x128xbf16> to vector<128x128xbf16>
    %cst_8 = arith.constant dense<0.000000e+00> : vector<8x128xf32>
    %8 = tpu.matmul %5, %7, %cst_8 {dimension_numbers = #tpu.dot_dimension_numbers<[1], [0], [0], [1], [0, 0, 1, 1], [], []>} : vector<8x128xbf16>, vector<128x128xbf16>, vector<8x128xf32> -> vector<8x128xf32>
    %c0_9 = arith.constant 0 : index
    %c0_10 = arith.constant 0 : index
    %c0_11 = arith.constant 0 : index
    %c0_12 = arith.constant 0 : index
    %9 = vector.load %arg5[%c0_9, %c0_10, %c0_11, %c0_12] : memref<1x1x8x128xf32, #tpu.memory_space<vmem>>, vector<1x1x8x128xf32>
    %10 = vector.shape_cast %9 : vector<1x1x8x128xf32> to vector<8x128xf32>
    %11 = vector.shape_cast %8 : vector<8x128xf32> to vector<1x1x8x128xf32>
    tpu.vector_store %arg5[%c0_9, %c0_10, %c0_11, %c0_12], %11 {strides = array<i32>} : memref<1x1x8x128xf32, #tpu.memory_space<vmem>>, vector<1x1x8x128xf32>,
    return
  }
  func.func @transform_0(%arg0: i32, %arg1: i32) -> (i32, i32, i32) {
    %c0_i32 = arith.constant 0 : i32
    %c0_i32_0 = arith.constant 0 : i32
    %c0_i32_1 = arith.constant 0 : i32
    return %arg1, %c0_i32, %c0_i32_0 : i32, i32, i32
  }
  func.func @transform_1(%arg0: i32, %arg1: i32) -> (i32, i32, i32) {
    %c0_i32 = arith.constant 0 : i32
    %c0_i32_0 = arith.constant 0 : i32
    %c0_i32_1 = arith.constant 0 : i32
    return %arg0, %c0_i32, %c0_i32_0 : i32, i32, i32
  }
  func.func @transform_2(%arg0: i32, %arg1: i32) -> (i32, i32, i32) {
    %c0_i32 = arith.constant 0 : i32
    %c0_i32_0 = arith.constant 0 : i32
    %c0_i32_1 = arith.constant 0 : i32
    return %arg1, %c0_i32, %c0_i32_0 : i32, i32, i32
  }
  func.func @transform_3(%arg0: i32, %arg1: i32) -> (i32, i32, i32, i32) {
    %c0_i32 = arith.constant 0 : i32
    %c0_i32_0 = arith.constant 0 : i32
    %c0_i32_1 = arith.constant 0 : i32
    return %arg1, %arg0, %c0_i32, %c0_i32_0 : i32, i32, i32, i32
  }
}

module attributes {stable_mosaic.version = 11 : i64} {
  func.func @_biaffine_kernel(%arg0: i32, %arg1: i32, %arg2: memref<1x8x128xbf16, #tpu.memory_space<vmem>>, %arg3: memref<1x128x128xbf16, #tpu.memory_space<vmem>>, %arg4: memref<1x128x128xbf16, #tpu.memory_space<vmem>>, %arg5: memref<1x1x8x128xf32, #tpu.memory_space<vmem>>) attributes {dimension_semantics = [#tpu.dimension_semantics<parallel>, #tpu.dimension_semantics<parallel>], iteration_bounds = array<i64: 4, 2>, scalar_prefetch = 0 : i64, scratch_operands = 0 : i64, tpu.core_type = #tpu.core_type<tc>, window_params = [{transform_indices = @transform_0, window_bounds = array<i64: 1, 8, 128>}, {transform_indices = @transform_1, window_bounds = array<i64: 1, 128, 128>}, {transform_indices = @transform_2, window_bounds = array<i64: 1, 128, 128>}, {transform_indices = @transform_3, window_bounds = array<i64: 1, 1, 8, 128>}]} {
    %c0 = arith.constant 0 : index
    %c0_0 = arith.constant 0 : index
    %c0_1 = arith.constant 0 : index
    %0 = vector.load %arg2[%c0, %c0_0, %c0_1] : memref<1x8x128xbf16, #tpu.memory_space<vmem>>, vector<1x8x128xbf16>
    %1 = vector.shape_cast %0 : vector<1x8x128xbf16> to vector<8x128xbf16>
    %c0_2 = arith.constant 0 : index
    %c0_3 = arith.constant 0 : index
    %c0_4 = arith.constant 0 : index
    %2 = vector.load %arg3[%c0_2, %c0_3, %c0_4] : memref<1x128x128xbf16, #tpu.memory_space<vmem>>, vector<1x128x128xbf16>
    %3 = vector.shape_cast %2 : vector<1x128x128xbf16> to vector<128x128xbf16>
    %cst = arith.constant dense<0.000000e+00> : vector<8x128xf32>
    %4 = tpu.matmul %1, %3, %cst {dimension_numbers = #tpu.dot_dimension_numbers<[1], [0], [0], [1], [0, 0, 1, 1], [], []>} : vector<8x128xbf16>, vector<128x128xbf16>, vector<8x128xf32> -> vector<8x128xf32>
    %5 = arith.truncf %4 : vector<8x128xf32> to vector<8x128xbf16>
    %c0_5 = arith.constant 0 : index
    %c0_6 = arith.constant 0 : index
    %c0_7 = arith.constant 0 : index
    %6 = vector.load %arg4[%c0_5, %c0_6, %c0_7] : memref<1x128x128xbf16, #tpu.memory_space<vmem>>, vector<1x128x128xbf16>
    %7 = vector.shape_cast %6 : vector<1x128x128xbf16> to vector<128x128xbf16>
    %cst_8 = arith.constant dense<0.000000e+00> : vector<8x128xf32>
    %8 = tpu.matmul %5, %7, %cst_8 {dimension_numbers = #tpu.dot_dimension_numbers<[1], [0], [0], [1], [0, 0, 1, 1], [], []>} : vector<8x128xbf16>, vector<128x128xbf16>, vector<8x128xf32> -> vector<8x128xf32>
    %c0_9 = arith.constant 0 : index
    %c0_10 = arith.constant 0 : index
    %c0_11 = arith.constant 0 : index
    %c0_12 = arith.constant 0 : index
    %9 = vector.load %arg5[%c0_9, %c0_10, %c0_11, %c0_12] : memref<1x1x8x128xf32, #tpu.memory_space<vmem>>, vector<1x1x8x128xf32>
    %10 = vector.shape_cast %9 : vector<1x1x8x128xf32> to vector<8x128xf32>
    %11 = vector.shape_cast %8 : vector<8x128xf32> to vector<1x1x8x128xf32>
    tpu.vector_store %arg5[%c0_9, %c0_10, %c0_11, %c0_12], %11 {strides = array<i32>} : memref<1x1x8x128xf32, #tpu.memory_space<vmem>>, vector<1x1x8x128xf32>,
    return
  }
  func.func @transform_0(%arg0: i32, %arg1: i32) -> (i32, i32, i32) {
    %c0_i32 = arith.constant 0 : i32
    %c0_i32_0 = arith.constant 0 : i32
    %c0_i32_1 = arith.constant 0 : i32
    return %arg1, %c0_i32, %c0_i32_0 : i32, i32, i32
  }
  func.func @transform_1(%arg0: i32, %arg1: i32) -> (i32, i32, i32) {
    %c0_i32 = arith.constant 0 : i32
    %c0_i32_0 = arith.constant 0 : i32
    %c0_i32_1 = arith.constant 0 : i32
    return %arg0, %c0_i32, %c0_i32_0 : i32, i32, i32
  }
  func.func @transform_2(%arg0: i32, %arg1: i32) -> (i32, i32, i32) {
    %c0_i32 = arith.constant 0 : i32
    %c0_i32_0 = arith.constant 0 : i32
    %c0_i32_1 = arith.constant 0 : i32
    return %arg1, %c0_i32, %c0_i32_0 : i32, i32, i32
  }
  func.func @transform_3(%arg0: i32, %arg1: i32) -> (i32, i32, i32, i32) {
    %c0_i32 = arith.constant 0 : i32
    %c0_i32_0 = arith.constant 0 : i32
    %c0_i32_1 = arith.constant 0 : i32
    return %arg1, %arg0, %c0_i32, %c0_i32_0 : i32, i32, i32, i32
  }
}

</mosaic_0001>

<bundles_post_ra>
// kernel: custom-call.5
= control target key start
LH: loop header
LB: loop body
LE: loop exit
PB: predicated region body
PF: predicated region fallthrough
CT: control target
= control target key end

     0   :  { %s6_s0 = inlined_call_operand.vmem [shape: f32[2,2,32], index: 0, kind: output, shape index: {}]  }

// kernel: custom-call.4
= control target key start
LH: loop header
LB: loop body
LE: loop exit
PB: predicated region body
PF: predicated region fallthrough
CT: control target
= control target key end

     0   :  { %s6_s0 = inlined_call_operand.vmem [shape: bf16[2,2,32], index: 0, kind: output, shape index: {}]  }

// kernel: biaffine_parser_forward.6
= control target key start
LH: loop header
LB: loop body
LE: loop exit
PB: predicated region body
PF: predicated region fallthrough
CT: control target
= control target key end

     0   :  { %v237_v1 = vmov 0   ;;  %s316_s1 = inlined_call_operand.vmem [shape: bf16[128,256], index: 1, kind: input, shape index: {}]   ;;  %s317_s0 = inlined_call_operand.vmem [shape: bf16[16,128], index: 0, kind: input, shape index: {}]   ;;  %s318_s2 = inlined_call_operand.vmem [shape: f32[16,256], index: 2, kind: output, shape index: {}]  }
   0x1   :  { %v212_v0 = vld [vmem:[%s316_s1 + $0x74] ss:$8 sps:$4 sm:$0xff]   ;;  %160 = vmatprep.mubr.bf16.mxu0 %v237_v1  ;;  %v214_v2 = vld [vmem:[%s316_s1 + $0x70] ss:$8 sps:$4 sm:$0xff]   ;;  %v215_v3 = vld [vmem:[%s316_s1 + $0x64] ss:$8 sps:$4 sm:$0xff]  }
   0x2   :  { %128 = vmatprep.subr.bf16.mxu0 %v212_v0  ;;  %v217_v4 = vld [vmem:[%s316_s1 + $0x60] ss:$8 sps:$4 sm:$0xff]   ;;  %v218_v5 = vld [vmem:[%s316_s1 + $0x54] ss:$8 sps:$4 sm:$0xff]   ;;  %v220_v6 = vld [vmem:[%s316_s1 + $0x50] ss:$8 sps:$4 sm:$0xff]  }
   0x3   :  { %129 = vmatpush1.bf16.msra.mxu0 %v214_v2  ;;  %v221_v7 = vld [vmem:[%s316_s1 + $0x44] ss:$8 sps:$4 sm:$0xff]   ;;  %v223_v8 = vld [vmem:[%s316_s1 + $0x40] ss:$8 sps:$4 sm:$0xff]   ;;  %v224_v9 = vld [vmem:[%s316_s1 + $0x34] ss:$8 sps:$4 sm:$0xff]  }
   0x4   :  { %130 = vmatprep.subr.bf16.mxu0 %v215_v3  ;;  %v226_v10 = vld [vmem:[%s316_s1 + $0x30] ss:$8 sps:$4 sm:$0xff]   ;;  %v227_v11 = vld [vmem:[%s316_s1 + $0x24] ss:$8 sps:$4 sm:$0xff]   ;;  %v229_v12 = vld [vmem:[%s316_s1 + $0x20] ss:$8 sps:$4 sm:$0xff]  }
   0x5   :  { %v230_v13 = vld [vmem:[%s316_s1 + $0x14] ss:$8 sps:$4 sm:$0xff]   ;;  %v232_v14 = vld [vmem:[%s316_s1 + $0x10] ss:$8 sps:$4 sm:$0xff]   ;;  %v233_v15 = vld [vmem:[%s316_s1 + $0x4] ss:$8 sps:$4 sm:$0xff]  }
   0x6   :  { %v235_v16 = vld [vmem:[%s316_s1] ss:$8 sps:$4 sm:$0xff]  }
   0x7   :  { %131 = vmatpush1.bf16.msra.mxu0 %v217_v4  ;;  %v236_v17 = vld [vmem:[%s317_s0] sm:$0xff]  }
   0x8   :  { %132 = vmatprep.subr.bf16.mxu0 %v218_v5 }
   0xb   :  { %133 = vmatpush1.bf16.msra.mxu0 %v220_v6 }
   0xc   :  { %134 = vmatprep.subr.bf16.mxu0 %v221_v7 }
   0xf   :  { %135 = vmatpush1.bf16.msra.mxu0 %v223_v8 }
  0x10   :  { %136 = vmatprep.subr.bf16.mxu0 %v224_v9 }
  0x13   :  { %137 = vmatpush1.bf16.msra.mxu0 %v226_v10 }
  0x14   :  { %138 = vmatprep.subr.bf16.mxu0 %v227_v11 }
  0x17   :  { %139 = vmatpush1.bf16.msra.mxu0 %v229_v12 }
  0x18   :  { %140 = vmatprep.subr.bf16.mxu0 %v230_v13 }
  0x1b   :  { %141 = vmatpush1.bf16.msra.mxu0 %v232_v14 }
  0x1c   :  { %142 = vmatprep.subr.bf16.mxu0 %v233_v15 }
  0x1f   :  { %143 = vmatpush1.bf16.msra.mxu0 %v235_v16 }
  0x22   :  { %161 = vmatmul.mubr.bf16.vlgmr.msra.gmra.mxu0 %v236_v17 }
  0xe2   :  { %v162_v18 = vpop.f32.mrf.mxu0 }
  0xe3   :  { %186 = vst [vmem:[%s318_s2] sm:$0xff] %v162_v18 }
  0xe4   :  { %v164_v19 = vpop.f32.mrf.mxu0 }
  0xe5   :  { %187 = vst [vmem:[%s318_s2 + $0x8] sm:$0xff] %v164_v19 }
  0xe6   :  { %v166_v20 = vpop.f32.mrf.mxu0 }
  0xe7   :  { %188 = vst [vmem:[%s318_s2 + $0x10] sm:$0xff] %v166_v20 }
  0xe8   :  { %v168_v21 = vpop.f32.mrf.mxu0 }
  0xe9   :  { %189 = vst [vmem:[%s318_s2 + $0x18] sm:$0xff] %v168_v21 }

// kernel: biaffine_parser_forward.9
= control target key start
LH: loop header
LB: loop body
LE: loop exit
PB: predicated region body
PF: predicated region fallthrough
CT: control target
= control target key end

     0   :  { %s922_s18 = smov 0   ;;  %s924_s19 = smov 0   ;;  %s1029_s0 = inlined_call_operand.vmem [shape: bf16[16,128], index: 0, kind: input, shape index: {}]   ;;  %s1030_s1 = inlined_call_operand.vmem [shape: bf16[5,128,128], index: 1, kind: input, shape index: {}]   ;;  %s1031_s2 = inlined_call_operand.vmem [shape: f32[5,1,128], index: 2, kind: input, shape index: {}]   ;;  %s1032_s3 = inlined_call_operand.vmem [shape: bf16[5,128,128], index: 3, kind: input, shape index: {}]   ;;  %s1033_s4 = inlined_call_operand.vmem [shape: f32[5,1,128], index: 4, kind: input, shape index: {}]   ;;  %s1034_s5 = inlined_call_operand.vmem [shape: f32[16,640], index: 5, kind: output, shape index: {}]  }
   0x1   :  { %s926_s20 = smov 0   ;;  %s928_s21 = smov 0  }
   0x2   :  { %s930_s22 = smov 0  }
   0x3 LB: > { %s697_s23 = sadd.s32 4294967295, %s888_s22   ;;  %s27_s24 = sadd.s32 1, %s884_s21  ;;  %s888_s22 = sphi %s930_s22, %s15_s22   ;;  %s884_s21 = sphi %s928_s21, %s1039_s21   ;;  %s880_s20 = sphi %s926_s20, %s1038_s20   ;;  %s876_s19 = sphi %s924_s19, %s1037_s19   ;;  %s872_s18 = sphi %s922_s18, %s1036_s18  }
   0x4   : > { %p29_p0 = scmp.ge.s32.totalorder %s27_s24, 5  ;;  %s166_s25 = sadd.s32 1, %s876_s19 }
   0x5   : > { %p176_p1 = scmp.ne.s32.totalorder %s876_s19, %s872_s18  ;;  %p177_p2 = scmp.eq.s32.totalorder %s697_s23, 4 }
   0x6   : > { %s1041_s24 = smov (%p29_p0, %s27_s24), 0  ;;  %p702_p4 = scmp.ge.s32.totalorder %s888_s22, 1 }
   0x7   : > { %p954_p3 = por %p177_p2, %p176_p1  ;;  %s162_s27 = ssub.s32 %s884_s21, %s1041_s24 }
   0x8   : > { %p238_p5 = scmp.lt.s32.totalorder %s888_s22, 6  ;;  %p164_p6 = scmp.eq.s32.totalorder %s162_s27, 0 }
   0xa   : > { %p239_p7 = pnand %p702_p4, %p238_p5 }
   0xb   : > { %s963_s28 = scalar_select %p164_p6, %s876_s19, %s166_s25  }
   0xc   : > { %242 = sbr.rel (%p239_p7) target bundleno = 464 (0x1d0), region = 40  ;;  %p287_p8 = scmp.lt.s32.totalorder (!%p239_p7), %s880_s20, 4 }
   0xd   : > { %s278_s17 = sand.u32 (!%p239_p7), 1, %s872_s18  }
  0x11   : > { %v890_v0 = vmov 0.0   ;;  %vm891_vm0 = vmmov 0   ;;  %s967_s29 = scalar_select %p287_p8, %s880_s20, 4  ;;  %v841_v14 = vld [vmem:[%s1029_s0] sm:$0xff]  }
  0x12   : > { %751 = vmatprep.subr.bf16.mxu0 %v890_v0  ;;  %767 = vmatprep.mubr.msk.bf16.mxu0 %vm891_vm0, %v890_v0  ;;  %s728_s18 = sshll.u32 (%p954_p3), %s880_s20, 3 }
  0x13   : > { %771 = vmatprep.subr.bf16.mxu1 %v890_v0  ;;  %787 = vmatprep.mubr.msk.bf16.mxu1 %vm891_vm0, %v890_v0  ;;  %s731_s30 = sshll.u32 %s967_s29, 6  ;;  %s294_s16 = scalar_lea.vmem %s1031_s2, %s967_s29 }
  0x14   : > { %s973_s8 = scalar_lea.vmem %s1030_s1, %s731_s30  ;;  %s980_s11 = scalar_lea.vmem %s1032_s3, %s731_s30  ;;  %v708_v18 = vld [vmem:[%s294_s16] ss:$0 sm:$0xff] }
  0x15   : > { %v833_v1 = vld [vmem:[%s973_s8 + $0x38] sm:$0xff]   ;;  %v834_v2 = vld [vmem:[%s973_s8 + $0x30] sm:$0xff]   ;;  %v835_v3 = vld [vmem:[%s973_s8 + $0x28] sm:$0xff]   ;;  %s302_s27 = scalar_lea.vmem %s1033_s4, %s967_s29  ;;  %s703_s30 = sshll.u32 %s278_s17, 4 }
  0x16   : > { %752 = vmatpush3.bf16.msra.mxu0 %v833_v1  ;;  %v842_v4 = vld [vmem:[%s980_s11 + $0x38] sm:$0xff]   ;;  %v836_v5 = vld [vmem:[%s973_s8 + $0x20] sm:$0xff]   ;;  %v843_v6 = vld [vmem:[%s980_s11 + $0x30] sm:$0xff]   ;;  %s280_s6 = scalar_lea.vmem [#allocation2], %s703_s30 }
  0x17   : > { %753 = vmatprep.subr.bf16.mxu0 %v890_v0  ;;  %772 = vmatpush3.bf16.msra.mxu1 %v842_v4  ;;  %v837_v7 = vld [vmem:[%s973_s8 + $0x18] sm:$0xff]   ;;  %v844_v8 = vld [vmem:[%s980_s11 + $0x28] sm:$0xff]   ;;  %v838_v9 = vld [vmem:[%s973_s8 + $0x10] sm:$0xff]  }
  0x18   : > { %773 = vmatprep.subr.bf16.mxu1 %v890_v0  ;;  %v845_v10 = vld [vmem:[%s980_s11 + $0x20] sm:$0xff]   ;;  %v839_v11 = vld [vmem:[%s973_s8 + $0x8] sm:$0xff]   ;;  %v846_v12 = vld [vmem:[%s980_s11 + $0x18] sm:$0xff]  }
  0x19   : > { %v840_v13 = vld [vmem:[%s973_s8] sm:$0xff]   ;;  %v847_v15 = vld [vmem:[%s980_s11 + $0x10] sm:$0xff]   ;;  %v848_v16 = vld [vmem:[%s980_s11 + $0x8] sm:$0xff]   ;;  %s553_s8 = scalar_lea.vmem (%p954_p3), %s1034_s5, %s728_s18 }
  0x1a   : > { %754 = vmatpush3.bf16.msra.mxu0 %v834_v2  ;;  %v849_v17 = vld [vmem:[%s980_s11] sm:$0xff]  }
  0x1b   : > { %755 = vmatprep.subr.bf16.mxu0 %v890_v0  ;;  %774 = vmatpush3.bf16.msra.mxu1 %v843_v6  ;;  %v718_v28 = vld [vmem:[%s302_s27] ss:$0 sm:$0xff] }
  0x1c   : > { %775 = vmatprep.subr.bf16.mxu1 %v890_v0 }
  0x1e   : > { %756 = vmatpush3.bf16.msra.mxu0 %v835_v3 }
  0x1f   : > { %757 = vmatprep.subr.bf16.mxu0 %v890_v0  ;;  %776 = vmatpush3.bf16.msra.mxu1 %v844_v8 }
  0x20   : > { %777 = vmatprep.subr.bf16.mxu1 %v890_v0 }
  0x22   : > { %758 = vmatpush3.bf16.msra.mxu0 %v836_v5 }
  0x23   : > { %759 = vmatprep.subr.bf16.mxu0 %v890_v0  ;;  %778 = vmatpush3.bf16.msra.mxu1 %v845_v10 }
  0x24   : > { %779 = vmatprep.subr.bf16.mxu1 %v890_v0 }
  0x26   : > { %760 = vmatpush3.bf16.msra.mxu0 %v837_v7 }
  0x27   : > { %761 = vmatprep.subr.bf16.mxu0 %v890_v0  ;;  %780 = vmatpush3.bf16.msra.mxu1 %v846_v12 }
  0x28   : > { %781 = vmatprep.subr.bf16.mxu1 %v890_v0 }
  0x2a   : > { %762 = vmatpush3.bf16.msra.mxu0 %v838_v9 }
  0x2b   : > { %763 = vmatprep.subr.bf16.mxu0 %v890_v0  ;;  %782 = vmatpush3.bf16.msra.mxu1 %v847_v15 }
  0x2c   : > { %783 = vmatprep.subr.bf16.mxu1 %v890_v0 }
  0x2e   : > { %764 = vmatpush3.bf16.msra.mxu0 %v839_v11 }
  0x2f   : > { %765 = vmatprep.subr.bf16.mxu0 %v890_v0  ;;  %784 = vmatpush3.bf16.msra.mxu1 %v848_v16 }
  0x30   : > { %785 = vmatprep.subr.bf16.mxu1 %v890_v0 }
  0x32   : > { %766 = vmatpush3.bf16.msra.mxu0 %v840_v13 }
  0x33   : > { %786 = vmatpush3.bf16.msra.mxu1 %v849_v17 }
  0x35   : > { %768 = vmatmul.mubr.bf16.vlgmr.msra.gmra.mxu0 %v841_v14 }
  0xf5   : > { %v418_v19 = vpop.f32.mrf.mxu0 }
  0xf6   : > { %v419_v21 = vadd.f32 %v708_v18, %v418_v19 }
  0xf7   : > { %v769_v20 = vpop.f32.mrf.mxu0 }
  0xf8   : > { %v425_v25 = vmax.f32 %v419_v21, 0.0 }
  0xf9   : > { %v421_v22 = vpop.f32.mrf.mxu0 }
  0xfa   : > { %v422_v23 = vadd.f32 %v708_v18, %v421_v22 }
  0xfb   : > { %v770_v24 = vpop.f32.mrf.mxu0 }
  0xfc   : > { %v426_v26 = vmax.f32 %v422_v23, 0.0 }
  0xfe   : > { %v427_v27 = vpack.c.bf16 %v426_v26, %v425_v25 }
 0x100   : > { %788 = vmatmul.mubr.bf16.vlgmr.msra.gmra.mxu1 %v427_v27 }
 0x1c0   : > { %v533_v29 = vpop.f32.mrf.mxu1 }
 0x1c1   : > { %v534_v30 = vadd.f32 %v718_v28, %v533_v29 }
 0x1c2   : > { %v789_v31 = vpop.f32.mrf.mxu1 }
 0x1c3   : > { %540 = vst [vmem:[%s280_s6] sm:$0xff] %v534_v30  ;;  %548 = sbr.rel (!%p954_p3) target bundleno = 464 (0x1d0), region = 44 }
 0x1c4   : > { %v536_v32 = vpop.f32.mrf.mxu1 }
 0x1c5   : > { %v537_v33 = vadd.f32 %v718_v28, %v536_v32 }
 0x1c6   : > { %v790_v34 = vpop.f32.mrf.mxu1 }
 0x1c7   : > { %541 = vst [vmem:[%s280_s6 + $0x8] sm:$0xff] %v537_v33 }
 0x1ca   : > { %v584_v35 = vld [vmem:[%s280_s6] sm:$0xff] }
 0x1cb   : > { %585 = vst [vmem:[%s553_s8] sm:$0xff] %v584_v35 }
 0x1ce   : > { %v586_v36 = vld [vmem:[%s280_s6 + $0x8] sm:$0xff] }
 0x1cf   : > { %587 = vst [vmem:[%s553_s8 + $0x28] sm:$0xff] %v586_v36 }
 0x1d0 PF: > { %s15_s22 = sadd.s32 1, %s888_s22   ;;  %s1036_s18 = smov %s876_s19 }
 0x1d1   : > { %p12_p9 = scmp.ge.s32.totalorder %s15_s22, 7   ;;  %s1037_s19 = smov %s963_s28 }
 0x1d2   : > { %s1038_s20 = smov %s884_s21  ;;  %s1039_s21 = smov %s1041_s24 }
 0x1d3   :  { %14 = sbr.rel (!%p12_p9) target bundleno = 3 (0x3), region = 120 }

// kernel: biaffine_parser_forward.10
= control target key start
LH: loop header
LB: loop body
LE: loop exit
PB: predicated region body
PF: predicated region fallthrough
CT: control target
= control target key end

     0   :  { %s712_s12 = smov 0   ;;  %s714_s13 = smov 0   ;;  %s787_s0 = inlined_call_operand.vmem [shape: bf16[2,8,128], index: 0, kind: input, shape index: {}]   ;;  %s788_s1 = inlined_call_operand.vmem [shape: bf16[1,128,128], index: 1, kind: input, shape index: {}]   ;;  %s789_s2 = inlined_call_operand.vmem [shape: bf16[2,128,128], index: 2, kind: input, shape index: {}]   ;;  %s790_s3 = inlined_call_operand.vmem [shape: f32[2,1,8,128], index: 3, kind: output, shape index: {}]  }
   0x1   :  { %s716_s14 = smov 0  }
   0x2 LB: > { %s22_s15 = sadd.s32 1, %s684_s13  ;;  %p542_p0 = scmp.ge.s32.totalorder %s688_s14, 1  ;;  %s688_s14 = sphi %s716_s14, %s13_s14   ;;  %s684_s13 = sphi %s714_s13, %s792_s13   ;;  %s680_s12 = sphi %s712_s12, %s791_s12  }
   0x3   : > { %p23_p1 = scmp.ge.s32.totalorder %s22_s15, 2  ;;  %p170_p2 = scmp.lt.s32.totalorder %s688_s14, 3 }
   0x5   : > { %s794_s15 = smov (%p23_p1, %s22_s15), 0  ;;  %p171_p3 = pnand %p542_p0, %p170_p2 }
   0x6   : > { %p205_p4 = scmp.lt.s32.totalorder (!%p171_p3), %s680_s12, 1 }
   0x7   : > { %174 = sbr.rel (%p171_p3) target bundleno = 439 (0x1b7), region = 32 }
   0xc   : > { %v650_v0 = vld [vmem:[%s788_s1 + $0x38] sm:$0xff]   ;;  %v690_v1 = vmov 0.0   ;;  %v651_v2 = vld [vmem:[%s788_s1 + $0x30] sm:$0xff]   ;;  %vm691_vm0 = vmmov 0   ;;  %s796_s12 = smov (!%p205_p4, %s680_s12), 1  ;;  %v652_v3 = vld [vmem:[%s788_s1 + $0x28] sm:$0xff]  }
   0xd   : > { %584 = vmatprep.subr.bf16.mxu0 %v690_v1  ;;  %604 = vmatprep.subr.bf16.mxu1 %v690_v1  ;;  %s565_s22 = sshll.u32 %s796_s12, 6  ;;  %v653_v5 = vld [vmem:[%s788_s1 + $0x20] sm:$0xff]   ;;  %v654_v7 = vld [vmem:[%s788_s1 + $0x18] sm:$0xff]   ;;  %v655_v9 = vld [vmem:[%s788_s1 + $0x10] sm:$0xff]   ;;  %s543_s7 = sshll.u32 %s796_s12, 2 }
   0xe   : > { %585 = vmatpush3.bf16.msra.mxu0 %v650_v0  ;;  %600 = vmatprep.mubr.msk.bf16.mxu0 %vm691_vm0, %v690_v1  ;;  %s745_s25 = scalar_lea.vmem %s789_s2, %s565_s22  ;;  %v656_v11 = vld [vmem:[%s788_s1 + $0x8] sm:$0xff]   ;;  %v657_v13 = vld [vmem:[%s788_s1] sm:$0xff]   ;;  %s208_s16 = scalar_lea.vmem %s787_s0, %s543_s7 }
   0xf   : > { %586 = vmatprep.subr.bf16.mxu0 %v690_v1  ;;  %620 = vmatprep.mubr.msk.bf16.mxu1 %vm691_vm0, %v690_v1  ;;  %v658_v4 = vld [vmem:[%s745_s25 + $0x38] sm:$0xff]   ;;  %v659_v6 = vld [vmem:[%s745_s25 + $0x30] sm:$0xff]   ;;  %v660_v8 = vld [vmem:[%s745_s25 + $0x28] sm:$0xff]   ;;  %s546_s17 = sshll.u32 %s796_s12, 3 }
  0x10   : > { %605 = vmatpush3.bf16.msra.mxu1 %v658_v4  ;;  %v661_v10 = vld [vmem:[%s745_s25 + $0x20] sm:$0xff]   ;;  %v662_v12 = vld [vmem:[%s745_s25 + $0x18] sm:$0xff]   ;;  %v663_v14 = vld [vmem:[%s745_s25 + $0x10] sm:$0xff]   ;;  %s225_s20 = scalar_lea.vmem %s790_s3, %s546_s17 }
  0x11   : > { %606 = vmatprep.subr.bf16.mxu1 %v690_v1  ;;  %v227_v15 = vld [vmem:[%s208_s16] sm:$0xf]  ;;  %v664_v16 = vld [vmem:[%s745_s25 + $0x8] sm:$0xff]  }
  0x12   : > { %587 = vmatpush3.bf16.msra.mxu0 %v651_v2  ;;  %v665_v17 = vld [vmem:[%s745_s25] sm:$0xff]  }
  0x13   : > { %588 = vmatprep.subr.bf16.mxu0 %v690_v1 }
  0x14   : > { %607 = vmatpush3.bf16.msra.mxu1 %v659_v6 }
  0x15   : > { %608 = vmatprep.subr.bf16.mxu1 %v690_v1 }
  0x16   : > { %589 = vmatpush3.bf16.msra.mxu0 %v652_v3 }
  0x17   : > { %590 = vmatprep.subr.bf16.mxu0 %v690_v1 }
  0x18   : > { %609 = vmatpush3.bf16.msra.mxu1 %v660_v8 }
  0x19   : > { %610 = vmatprep.subr.bf16.mxu1 %v690_v1 }
  0x1a   : > { %591 = vmatpush3.bf16.msra.mxu0 %v653_v5 }
  0x1b   : > { %592 = vmatprep.subr.bf16.mxu0 %v690_v1 }
  0x1c   : > { %611 = vmatpush3.bf16.msra.mxu1 %v661_v10 }
  0x1d   : > { %612 = vmatprep.subr.bf16.mxu1 %v690_v1 }
  0x1e   : > { %593 = vmatpush3.bf16.msra.mxu0 %v654_v7 }
  0x1f   : > { %594 = vmatprep.subr.bf16.mxu0 %v690_v1 }
  0x20   : > { %613 = vmatpush3.bf16.msra.mxu1 %v662_v12 }
  0x21   : > { %614 = vmatprep.subr.bf16.mxu1 %v690_v1 }
  0x22   : > { %595 = vmatpush3.bf16.msra.mxu0 %v655_v9 }
  0x23   : > { %596 = vmatprep.subr.bf16.mxu0 %v690_v1 }
  0x24   : > { %615 = vmatpush3.bf16.msra.mxu1 %v663_v14 }
  0x25   : > { %616 = vmatprep.subr.bf16.mxu1 %v690_v1 }
  0x26   : > { %597 = vmatpush3.bf16.msra.mxu0 %v656_v11 }
  0x27   : > { %598 = vmatprep.subr.bf16.mxu0 %v690_v1 }
  0x28   : > { %617 = vmatpush3.bf16.msra.mxu1 %v664_v16 }
  0x29   : > { %618 = vmatprep.subr.bf16.mxu1 %v690_v1 }
  0x2a   : > { %599 = vmatpush3.bf16.msra.mxu0 %v657_v13 }
  0x2c   : > { %619 = vmatpush3.bf16.msra.mxu1 %v665_v17 }
  0x2d   : > { %601 = vmatmul.mubr.bf16.vlgmr.msra.gmra.mxu0 %v227_v15 }
  0xed   : > { %v326_v18 = vpop.f32.mrf.mxu0 }
  0xee   : > { %v332_v19 = vpack.c.bf16 %v326_v18, %v326_v18 }
  0xef   : > { %v602_v20 = vpop.f32.mrf.mxu0 }
  0xf0   : > { %621 = vmatmul.mubr.bf16.vlgmr.msra.gmra.mxu1 %v332_v19 }
  0xf1   : > { %v329_v21 = vpop.f32.mrf.mxu0 }
  0xf3   : > { %v603_v22 = vpop.f32.mrf.mxu0 }
 0x1b0   : > { %v431_v23 = vpop.f32.mrf.mxu1 }
 0x1b1   : > { %437 = vst [vmem:[%s225_s20] sm:$0xff] %v431_v23 }
 0x1b2   : > { %v622_v24 = vpop.f32.mrf.mxu1 }
 0x1b4   : > { %v434_v25 = vpop.f32.mrf.mxu1 }
 0x1b6   : > { %v623_v26 = vpop.f32.mrf.mxu1 }
 0x1b7 PF: > { %s13_s14 = sadd.s32 1, %s688_s14   ;;  %s791_s12 = smov %s684_s13 }
 0x1b8   : > { %p10_p5 = scmp.ge.s32.totalorder %s13_s14, 4   ;;  %s792_s13 = smov %s794_s15 }
 0x1ba   :  { %12 = sbr.rel (!%p10_p5) target bundleno = 2 (0x2), region = 68 }

// kernel: biaffine_parser_forward.11
= control target key start
LH: loop header
LB: loop body
LE: loop exit
PB: predicated region body
PF: predicated region fallthrough
CT: control target
= control target key end

     0   :  { %8 = vsyncpa [#allocation3], 0  ;;  %s1008_s0 = inlined_call_operand.vmem [shape: bf16[2,8,128], index: 0, kind: input, shape index: {}]   ;;  %s1009_s1 = inlined_call_operand.vmem [shape: bf16[4,128,128], index: 1, kind: input, shape index: {}]   ;;  %s1010_s2 = inlined_call_operand.vmem [shape: bf16[2,128,128], index: 2, kind: input, shape index: {}]   ;;  %s1011_s3 = inlined_call_operand.hbm [shape: f32[2,4,8,128], index: 3, kind: output, shape index: {}]  }
   0x1   :  { %10 = vsyncpa [#allocation3 + $0x1], 0  ;;  %s842_s12 = smov 0   ;;  %s844_s13 = smov 0  }
   0x2   :  { %s846_s14 = smov 0   ;;  %s848_s15 = smov 0  }
   0x3   :  { %s850_s16 = smov 0   ;;  %s852_s17 = smov 0  }
   0x4   :  { %s854_s18 = smov 0   ;;  %s856_s19 = smov 0  }
   0x5 LB: > { %s544_s20 = sadd.s32 4294967295, %s817_s19   ;;  %s545_s21 = sadd.s32 4294967294, %s817_s19   ;;  %s817_s19 = sphi %s856_s19, %s16_s19   ;;  %s813_s18 = sphi %s854_s18, %s1020_s18   ;;  %s809_s17 = sphi %s852_s17, %s1019_s17   ;;  %s805_s16 = sphi %s850_s16, %s1018_s16   ;;  %s801_s15 = sphi %s848_s15, %s1017_s15   ;;  %s797_s14 = sphi %s846_s14, %s1016_s14   ;;  %s793_s13 = sphi %s844_s13, %s1015_s13   ;;  %s789_s12 = sphi %s842_s12, %s1014_s12  }
   0x6   : > { %s25_s22 = sadd.s32 1, %s809_s17  ;;  %s28_s23 = sadd.s32 1, %s813_s18 }
   0x7   : > { %p26_p0 = scmp.ge.s32.totalorder %s25_s22, 2  ;;  %p125_p1 = scmp.ne.s32.totalorder %s797_s14, %s793_s13 }
   0x8   : > { %p126_p2 = scmp.eq.s32.totalorder %s544_s20, 7  ;;  %p131_p5 = scmp.ne.s32.totalorder %s793_s13, %s789_s12 }
   0x9   : > { %s1022_s22 = smov (%p26_p0, %s25_s22), 0  ;;  %s1024_s23 = smov (!%p26_p0, %s28_s23), %s813_s18 }
   0xa   : > { %s110_s24 = ssub.s32 %s809_s17, %s1022_s22  ;;  %p893_p3 = por %p126_p2, %p125_p1 }
   0xb   : > { %p30_p4 = scmp.ge.s32.totalorder %s1024_s23, 4  ;;  %p132_p6 = scmp.eq.s32.totalorder %s545_s21, 7 }
   0xc   : > { %p548_p7 = scmp.ge.s32.totalorder %s817_s19, 1  ;;  %p173_p9 = scmp.lt.s32.totalorder %s817_s19, 9 }
   0xd   : > { %s1026_s23 = smov (%p30_p4, %s1024_s23), 0  ;;  %p902_p8 = por %p132_p6, %p131_p5 }
   0xe   : > { %s111_s27 = ssub.s32 %s813_s18, %s1026_s23  ;;  %s115_s28 = sadd.s32 1, %s797_s14 }
   0xf   : > { %s112_s29 = sor.u32 %s111_s27, %s110_s24  ;;  %p174_p10 = pnand %p548_p7, %p173_p9 }
  0x10   : > { %p113_p11 = scmp.eq.s32.totalorder %s112_s29, 0  ;;  %p210_p12 = scmp.lt.s32.totalorder (!%p174_p10), %s805_s16, 3 }
  0x11   : > { %177 = sbr.rel (%p174_p10) target bundleno = 462 (0x1ce), region = 32  ;;  %p206_p13 = scmp.lt.s32.totalorder (!%p174_p10), %s801_s15, 1 }
  0x12   : > { %s911_s30 = scalar_select %p113_p11, %s797_s14, %s115_s28  }
  0x16   : > { %v819_v0 = vmov 0.0   ;;  %vm820_vm0 = vmmov 0   ;;  %s211_s4 = scalar_select %p210_p12, %s805_s16, 3 }
  0x17   : > { %596 = vmatprep.subr.bf16.mxu0 %v819_v0  ;;  %612 = vmatprep.mubr.msk.bf16.mxu0 %vm820_vm0, %v819_v0  ;;  %s923_s9 = scalar_select %p206_p13, %s801_s15, 1 }
  0x18   : > { %616 = vmatprep.subr.bf16.mxu1 %v819_v0  ;;  %632 = vmatprep.mubr.msk.bf16.mxu1 %vm820_vm0, %v819_v0  ;;  %s576_s5 = sshll.u32 %s211_s4, 6  ;;  %s203_s4 = sand.u32 1, %s793_s13  }
  0x19   : > { %s919_s8 = scalar_lea.vmem %s1009_s1, %s576_s5  ;;  %s577_s10 = sshll.u32 %s923_s9, 6 }
  0x1a   : > { %v709_v1 = vld [vmem:[%s919_s8 + $0x38] sm:$0xff]   ;;  %v710_v2 = vld [vmem:[%s919_s8 + $0x30] sm:$0xff]   ;;  %v711_v3 = vld [vmem:[%s919_s8 + $0x28] sm:$0xff]   ;;  %s931_s21 = scalar_lea.vmem %s1010_s2, %s577_s10  ;;  %s550_s24 = sshll.u32 %s923_s9, 2 }
  0x1b   : > { %597 = vmatpush3.bf16.msra.mxu0 %v709_v1  ;;  %v717_v4 = vld [vmem:[%s931_s21 + $0x38] sm:$0xff]   ;;  %v712_v5 = vld [vmem:[%s919_s8 + $0x20] sm:$0xff]   ;;  %v718_v6 = vld [vmem:[%s931_s21 + $0x30] sm:$0xff]   ;;  %s209_s29 = scalar_lea.vmem %s1008_s0, %s550_s24  ;;  %s572_s5 = sshll.u32 %s801_s15, 2 }
  0x1c   : > { %598 = vmatprep.subr.bf16.mxu0 %v819_v0  ;;  %617 = vmatpush3.bf16.msra.mxu1 %v717_v4  ;;  %v713_v7 = vld [vmem:[%s919_s8 + $0x18] sm:$0xff]   ;;  %v719_v8 = vld [vmem:[%s931_s21 + $0x28] sm:$0xff]   ;;  %v714_v9 = vld [vmem:[%s919_s8 + $0x10] sm:$0xff]   ;;  %s549_s6 = sshll.u32 %s203_s4, 3  ;;  %s444_s7 = sadd.s32 %s805_s16, %s572_s5 }
  0x1d   : > { %618 = vmatprep.subr.bf16.mxu1 %v819_v0  ;;  %v720_v10 = vld [vmem:[%s931_s21 + $0x20] sm:$0xff]   ;;  %v715_v11 = vld [vmem:[%s919_s8 + $0x8] sm:$0xff]   ;;  %v721_v12 = vld [vmem:[%s931_s21 + $0x18] sm:$0xff]   ;;  %s573_s10 = sshll.u32 %s444_s7, 7  ;;  %s433_s24 = scalar_lea.sflag [#allocation3], %s203_s4 }
  0x1e   : > { %v716_v13 = vld [vmem:[%s919_s8] sm:$0xff]   ;;  %v722_v14 = vld [vmem:[%s931_s21 + $0x10] sm:$0xff]   ;;  %v723_v16 = vld [vmem:[%s931_s21 + $0x8] sm:$0xff]   ;;  %s205_s8 = scalar_lea.vmem [#allocation2], %s549_s6  ;;  %s821_s16 = smov [#allocation2]  }
  0x1f   : > { %599 = vmatpush3.bf16.msra.mxu0 %v710_v2  ;;  %v221_v15 = vld [vmem:[%s209_s29] sm:$0xf]  ;;  %s448_s9 = sshll.u32 %s205_s8, 4  ;;  %s729_s27 = sshll.u32 %s821_s16, 4  ;;  %s953_s9 = int_to_ptr.vmem [resolvable:$true] %s448_s9  ;;  %s730_s27 = int_to_ptr.vmem [resolvable:$false] %s729_s27 }
  0x20   : > { %600 = vmatprep.subr.bf16.mxu0 %v819_v0  ;;  %619 = vmatpush3.bf16.msra.mxu1 %v718_v6  ;;  %v724_v17 = vld [vmem:[%s931_s21] sm:$0xff]   ;;  %s958_s21 = scalar_lea.hbm %s1011_s3, %s573_s10  ;;  %s725_s15 = scalar_lea.vmem %s953_s9, 128 }
  0x21   : > { %620 = vmatprep.subr.bf16.mxu1 %v819_v0  ;;  %p726_p0 = scmp.ne.s32.totalorder %s953_s9, %s725_s15  ;;  %s731_s28 = scalar_lea.vmem %s730_s27, 256 }
  0x22   : > { %p732_p4 = scmp.lt.s32.totalorder %s953_s9, %s730_s27  ;;  %p733_p5 = scmp.lt.s32.totalorder %s731_s28, %s725_s15 }
  0x23   : > { %601 = vmatpush3.bf16.msra.mxu0 %v711_v3  ;;  %p727_p1 = pnand %p726_p0, %p893_p3 }
  0x24   : > { %602 = vmatprep.subr.bf16.mxu0 %v819_v0  ;;  %621 = vmatpush3.bf16.msra.mxu1 %v719_v8  ;;  %p734_p6 = por %p733_p5, %p732_p4 }
  0x25   : > { %622 = vmatprep.subr.bf16.mxu1 %v819_v0  ;;  %p728_p2 = pneg %p727_p1 }
  0x27   : > { %603 = vmatpush3.bf16.msra.mxu0 %v712_v5  ;;  %p735_p7 = pnand %p734_p6, %p728_p2 }
  0x28   : > { %604 = vmatprep.subr.bf16.mxu0 %v819_v0  ;;  %623 = vmatpush3.bf16.msra.mxu1 %v720_v10 }
  0x29   : > { %624 = vmatprep.subr.bf16.mxu1 %v819_v0 }
  0x2b   : > { %605 = vmatpush3.bf16.msra.mxu0 %v713_v7 }
  0x2c   : > { %606 = vmatprep.subr.bf16.mxu0 %v819_v0  ;;  %625 = vmatpush3.bf16.msra.mxu1 %v721_v12 }
  0x2d   : > { %626 = vmatprep.subr.bf16.mxu1 %v819_v0 }
  0x2f   : > { %607 = vmatpush3.bf16.msra.mxu0 %v714_v9 }
  0x30   : > { %608 = vmatprep.subr.bf16.mxu0 %v819_v0  ;;  %627 = vmatpush3.bf16.msra.mxu1 %v722_v14 }
  0x31   : > { %628 = vmatprep.subr.bf16.mxu1 %v819_v0 }
  0x33   : > { %609 = vmatpush3.bf16.msra.mxu0 %v715_v11 }
  0x34   : > { %610 = vmatprep.subr.bf16.mxu0 %v819_v0  ;;  %629 = vmatpush3.bf16.msra.mxu1 %v723_v16 }
  0x35   : > { %630 = vmatprep.subr.bf16.mxu1 %v819_v0 }
  0x37   : > { %611 = vmatpush3.bf16.msra.mxu0 %v716_v13 }
  0x38   : > { %631 = vmatpush3.bf16.msra.mxu1 %v724_v17 }
  0x3a   : > { %613 = vmatmul.mubr.bf16.vlgmr.msra.gmra.mxu0 %v221_v15 }
  0xfa   : > { %v320_v18 = vpop.f32.mrf.mxu0 }
  0xfb   : > { %v326_v19 = vpack.c.bf16 %v320_v18, %v320_v18 }
  0xfc   : > { %v614_v20 = vpop.f32.mrf.mxu0 }
  0xfd   : > { %633 = vmatmul.mubr.bf16.vlgmr.msra.gmra.mxu1 %v326_v19 }
  0xfe   : > { %v323_v21 = vpop.f32.mrf.mxu0 }
 0x100   : > { %v615_v22 = vpop.f32.mrf.mxu0 }
 0x1bd   : > { %v425_v23 = vpop.f32.mrf.mxu1 }
 0x1be   : > { %431 = vst [vmem:[%s205_s8] sm:$0xff] %v425_v23 }
 0x1bf   : > { %v634_v24 = vpop.f32.mrf.mxu1 }
 0x1c0   : > { %738 = shalt.err (!%p735_p7)
}
 0x1c1   : > { %s739_s29 = scalar_lea.hbm %s958_s21, 128  ;;  %s743_s6 = scalar_lea.hbm %s1011_s3, 1024 }
 0x1c2   : > { %p740_p9 = scmp.ne.s32.totalorder %s958_s21, %s739_s29  ;;  %p744_p12 = scmp.lt.s32.totalorder %s958_s21, %s1011_s3 }
 0x1c3   : > { %p745_p13 = scmp.lt.s32.totalorder %s743_s6, %s739_s29 }
 0x1c4   : > { %p741_p10 = pnand %p740_p9, %p893_p3 }
 0x1c5   : > { %p746_p0 = por %p745_p13, %p744_p12 }
 0x1c6   : > { %p742_p11 = pneg %p741_p10 }
 0x1c8   : > { %p747_p1 = pnand %p746_p0, %p742_p11 }
 0x1ca   : > { %750 = shalt.err (!%p747_p1)
}
 0x1cb   : > { %636 = dma.vmem_to_hbm [thread:$0]  (%p893_p3), %s953_s9, 128, %s958_s21, %s433_s24   ;;  %v428_v25 = vpop.f32.mrf.mxu1 }
 0x1cd   : > { %v635_v26 = vpop.f32.mrf.mxu1 }
 0x1ce PF: > { %p642_p2 = scmp.ge.s32.totalorder %s817_s19, 2  ;;  %s460_s10 = sand.u32 1, %s789_s12  }
 0x1cf   : > { %s461_s11 = scalar_lea.sflag [#allocation3], %s460_s10 }
 0x1d0   : > { %p639_p4 = pnand %p642_p2, %p902_p8 }
 0x1d2   : > { %p640_p5 = pneg %p639_p4 }
 0x1d4   : > { %784 = dma.done.wait (%p640_p5), %s461_s11, 128  }
 0x1d5   : > { %786 = vsyncadd (%p640_p5), %s461_s11, 4294967168  ;;  %s16_s19 = sadd.s32 1, %s817_s19   ;;  %s1014_s12 = smov %s793_s13 }
 0x1d6   : > { %p13_p6 = scmp.ge.s32.totalorder %s16_s19, 10   ;;  %s1015_s13 = smov %s797_s14 }
 0x1d7   : > { %s1016_s14 = smov %s911_s30  ;;  %s1017_s15 = smov %s809_s17 }
 0x1d8   : > { %s1018_s16 = smov %s813_s18  ;;  %s1019_s17 = smov %s1022_s22 }
 0x1d9   : > { %s1020_s18 = smov %s1026_s23  ;;  %15 = sbr.rel (!%p13_p6) target bundleno = 5 (0x5), region = 73 }
 0x1de   :  { %466 = vsyncpa [#allocation3], 1 }
 0x1df   :  { %468 = vsyncpa [#allocation3 + $0x1], 1 }

</bundles_post_ra>
